<compile_context>
chip_gen: v6e
topology: v6e:2x2x1
jax: 0.10.0
libtpu: 0.0.40
codegen_flags: <defaults>
</compile_context>

<pallas_src>
import jax
import jax.numpy as jnp
from jax.experimental import pallas as pl
from jax.experimental.pallas import tpu as pltpu

_BN_EPS = 1e-5


def _write_padded(pad_ref, x):
    """Refresh the (h+2, w+2) padded scratch: zero 1-px border, interior := x.

    Only the border strips are cleared (the interior is fully rewritten every
    grid step), which is much cheaper than zeroing the whole scratch.
    """
    h, w = x.shape
    zrow = jnp.zeros((1, w + 2), jnp.float32)
    zcol = jnp.zeros((h + 2, 1), jnp.float32)
    pad_ref[0:1, :] = zrow
    pad_ref[h + 1:h + 2, :] = zrow
    pad_ref[:, 0:1] = zcol
    pad_ref[:, w + 1:w + 2] = zcol
    pad_ref[1:h + 1, 1:w + 1] = x


def _sobel_gx_gy(pad_ref, h, w):
    """Separable 3x3 Sobel (cross-correlation) from the zero-padded scratch."""
    r0 = pad_ref[0:h, :]          # rows i-1, shape (h, w+2)
    r1 = pad_ref[1:h + 1, :]      # rows i
    r2 = pad_ref[2:h + 2, :]      # rows i+1
    s = r0 + 2.0 * r1 + r2        # vertical [1, 2, 1] smoothing   (for Gx)
    d = r2 - r0                   # vertical [-1, 0, 1] difference (for Gy)
    gx = s[:, 2:w + 2] - s[:, 0:w]
    gy = d[:, 0:w] + 2.0 * d[:, 1:w + 1] + d[:, 2:w + 2]
    return gx, gy


def _stats_kernel(x_ref, part_ref, pad_ref):
    # x_ref: (1, 1, h, w) image tile; part_ref: (1, 1, 4) per-tile partials
    h, w = x_ref.shape[2], x_ref.shape[3]
    _write_padded(pad_ref, x_ref[0, 0])
    gx, gy = _sobel_gx_gy(pad_ref, h, w)
    lane = jax.lax.broadcasted_iota(jnp.int32, (1, 1, 4), 2)
    part_ref[...] = jnp.where(
        lane == 0, jnp.sum(gx),
        jnp.where(lane == 1, jnp.sum(gx * gx),
                  jnp.where(lane == 2, jnp.sum(gy), jnp.sum(gy * gy))))


def _apply_kernel(stats_ref, x_ref, out_ref, pad_ref):
    # stats_ref: SMEM (4,) = [scale_x, bias_x, scale_y, bias_y]
    h, w = x_ref.shape[2], x_ref.shape[3]
    _write_padded(pad_ref, x_ref[0, 0])
    gx, gy = _sobel_gx_gy(pad_ref, h, w)
    gxn = gx * stats_ref[0] + stats_ref[1]      # folded (x - mean) * rsqrt(var+eps)
    gyn = gy * stats_ref[2] + stats_ref[3]
    mag = jnp.sqrt(gxn * gxn + gyn * gyn)
    out_ref[0, 0] = jax.nn.sigmoid(mag)


@jax.jit
def sobel_forward(img):
    """img: (N, 1, H, W) float32 (NCHW, like the PyTorch module). Returns (N, 1, H, W)."""
    n, c, h, w = img.shape
    assert c == 1, "Sobel expects a single input channel"
    img = img.astype(jnp.float32)

    cparams = pltpu.CompilerParams(
        dimension_semantics=("parallel",),
        vmem_limit_bytes=32 * 1024 * 1024,
    )

    # ---- Pass 1: per-tile partial sums / sums-of-squares of the two Sobel channels.
    partials = pl.pallas_call(
        _stats_kernel,
        out_shape=jax.ShapeDtypeStruct((n, 1, 4), jnp.float32),
        grid_spec=pltpu.PrefetchScalarGridSpec(
            num_scalar_prefetch=0,
            grid=(n,),
            in_specs=[pl.BlockSpec((1, 1, h, w), lambda i: (i, 0, 0, 0))],
            out_specs=pl.BlockSpec((1, 1, 4), lambda i: (i, 0, 0)),
            scratch_shapes=[pltpu.VMEM((h + 2, w + 2), jnp.float32)]),
        compiler_params=cparams,
    )(img)

    # ---- Tiny XLA-side reduction of the partials -> folded BN scalars (f32).
    tot = jnp.sum(partials.reshape(n, 4), axis=0)
    cnt = jnp.float32(n * h * w)
    mean_x = tot[0] / cnt
    mean_y = tot[2] / cnt
    var_x = jnp.maximum(tot[1] / cnt - mean_x * mean_x, 0.0)
    var_y = jnp.maximum(tot[3] / cnt - mean_y * mean_y, 0.0)
    scale_x = jax.lax.rsqrt(var_x + _BN_EPS)
    scale_y = jax.lax.rsqrt(var_y + _BN_EPS)
    bias_x = -mean_x * scale_x
    bias_y = -mean_y * scale_y
    stats = jnp.stack([scale_x, bias_x, scale_y, bias_y]).astype(jnp.float32)

    # ---- Pass 2: recompute Sobel per tile, normalize with SMEM scalars, fuse
    #      square -> channel-sum -> sqrt -> sigmoid, write the output tile.
    out = pl.pallas_call(
        _apply_kernel,
        out_shape=jax.ShapeDtypeStruct((n, 1, h, w), jnp.float32),
        grid_spec=pltpu.PrefetchScalarGridSpec(
            num_scalar_prefetch=1,            # stats -> SMEM, passed to index_maps
            grid=(n,),
            in_specs=[pl.BlockSpec((1, 1, h, w), lambda i, stats: (i, 0, 0, 0))],
            out_specs=pl.BlockSpec((1, 1, h, w), lambda i, stats: (i, 0, 0, 0)),
            scratch_shapes=[pltpu.VMEM((h + 2, w + 2), jnp.float32)]),
        compiler_params=cparams,
    )(stats, img)
    return out


def _reference(img):
    """Pure-JAX reference of the PyTorch forward (train-mode BatchNorm)."""
    gx = jnp.array([[-1., 0., 1.], [-2., 0., 2.], [-1., 0., 1.]], jnp.float32)
    gy = jnp.array([[-1., -2., -1.], [0., 0., 0.], [1., 2., 1.]], jnp.float32)
    weight = jnp.stack([gx, gy])[:, None, :, :]                 # (2, 1, 3, 3)
    conv = jax.lax.conv_general_dilated(
        img.astype(jnp.float32), weight, window_strides=(1, 1),
        padding=((1, 1), (1, 1)), dimension_numbers=("NCHW", "OIHW", "NCHW"))
    mean = jnp.mean(conv, axis=(0, 2, 3), keepdims=True)
    var = jnp.mean((conv - mean) ** 2, axis=(0, 2, 3), keepdims=True)
    y = (conv - mean) * jax.lax.rsqrt(var + _BN_EPS)
    mag = jnp.sqrt(jnp.sum(y * y, axis=1, keepdims=True))
    return jax.nn.sigmoid(mag)


if __name__ == "__main__":
    key = jax.random.PRNGKey(0)
    img = jax.random.normal(key, (2, 1, 16, 16), dtype=jnp.float32)

    out = jax.block_until_ready(sobel_forward(img))
    ref = jax.block_until_ready(_reference(img))

    assert out.shape == (2, 1, 16, 16)
    err = jnp.max(jnp.abs(out - ref))
    assert err < 2e-4, f"max abs error {err}"

    print("KERNEL_OK")
</pallas_src>

<mosaic_0001>
module attributes {stable_mosaic.version = 11 : i64} {
  func.func @_stats_kernel(%arg0: i32, %arg1: memref<1x1x16x16xf32, #tpu.memory_space<vmem>>, %arg2: memref<1x1x4xf32, #tpu.memory_space<vmem>>, %arg3: memref<18x18xf32, #tpu.memory_space<vmem>>) attributes {dimension_semantics = [#tpu.dimension_semantics<parallel>], iteration_bounds = array<i64: 2>, scalar_prefetch = 0 : i64, scratch_operands = 1 : i64, tpu.core_type = #tpu.core_type<tc>, window_params = [{transform_indices = @transform_0, window_bounds = array<i64: 1, 1, 16, 16>}, {transform_indices = @transform_1, window_bounds = array<i64: 1, 1, 4>}]} {
    %c0 = arith.constant 0 : index
    %c0_0 = arith.constant 0 : index
    %c0_1 = arith.constant 0 : index
    %c0_2 = arith.constant 0 : index
    %0 = vector.load %arg1[%c0, %c0_0, %c0_1, %c0_2] : memref<1x1x16x16xf32, #tpu.memory_space<vmem>>, vector<1x1x16x16xf32>
    %1 = vector.shape_cast %0 : vector<1x1x16x16xf32> to vector<16x16xf32>
    %cst = arith.constant 0.000000e+00 : f32
    %2 = vector.broadcast %cst : f32 to vector<1x18xf32>
    %cst_3 = arith.constant 0.000000e+00 : f32
    %3 = vector.broadcast %cst_3 : f32 to vector<18x1xf32>
    %c0_4 = arith.constant 0 : index
    %c0_5 = arith.constant 0 : index
    %4 = vector.load %arg3[%c0_4, %c0_5] : memref<18x18xf32, #tpu.memory_space<vmem>>, vector<1x18xf32>
    tpu.vector_store %arg3[%c0_4, %c0_5], %2 {strides = array<i32>} : memref<18x18xf32, #tpu.memory_space<vmem>>, vector<1x18xf32>,
    %c17 = arith.constant 17 : index
    %c0_6 = arith.constant 0 : index
    %5 = vector.load %arg3[%c17, %c0_6] : memref<18x18xf32, #tpu.memory_space<vmem>>, vector<1x18xf32>
    tpu.vector_store %arg3[%c17, %c0_6], %2 {strides = array<i32>} : memref<18x18xf32, #tpu.memory_space<vmem>>, vector<1x18xf32>,
    %c0_7 = arith.constant 0 : index
    %c0_8 = arith.constant 0 : index
    %6 = vector.load %arg3[%c0_7, %c0_8] : memref<18x18xf32, #tpu.memory_space<vmem>>, vector<18x1xf32>
    tpu.vector_store %arg3[%c0_7, %c0_8], %3 {strides = array<i32>} : memref<18x18xf32, #tpu.memory_space<vmem>>, vector<18x1xf32>,
    %c0_9 = arith.constant 0 : index
    %c17_10 = arith.constant 17 : index
    %7 = vector.load %arg3[%c0_9, %c17_10] : memref<18x18xf32, #tpu.memory_space<vmem>>, vector<18x1xf32>
    tpu.vector_store %arg3[%c0_9, %c17_10], %3 {strides = array<i32>} : memref<18x18xf32, #tpu.memory_space<vmem>>, vector<18x1xf32>,
    %c1 = arith.constant 1 : index
    %c1_11 = arith.constant 1 : index
    %8 = vector.load %arg3[%c1, %c1_11] : memref<18x18xf32, #tpu.memory_space<vmem>>, vector<16x16xf32>
    tpu.vector_store %arg3[%c1, %c1_11], %1 {strides = array<i32>} : memref<18x18xf32, #tpu.memory_space<vmem>>, vector<16x16xf32>,
    %c0_12 = arith.constant 0 : index
    %c0_13 = arith.constant 0 : index
    %9 = vector.load %arg3[%c0_12, %c0_13] : memref<18x18xf32, #tpu.memory_space<vmem>>, vector<16x18xf32>
    %c1_14 = arith.constant 1 : index
    %c0_15 = arith.constant 0 : index
    %10 = vector.load %arg3[%c1_14, %c0_15] : memref<18x18xf32, #tpu.memory_space<vmem>>, vector<16x18xf32>
    %c2 = arith.constant 2 : index
    %c0_16 = arith.constant 0 : index
    %11 = vector.load %arg3[%c2, %c0_16] : memref<18x18xf32, #tpu.memory_space<vmem>>, vector<16x18xf32>
    %cst_17 = arith.constant 2.000000e+00 : f32
    %12 = vector.broadcast %cst_17 : f32 to vector<16x18xf32>
    %13 = arith.mulf %12, %10 : vector<16x18xf32>
    %14 = arith.addf %9, %13 : vector<16x18xf32>
    %15 = arith.addf %14, %11 : vector<16x18xf32>
    %16 = arith.subf %11, %9 : vector<16x18xf32>
    %17 = vector.extract_strided_slice %15 {offsets = [0, 2], sizes = [16, 16], strides = [1, 1]} : vector<16x18xf32> to vector<16x16xf32>
    %18 = vector.extract_strided_slice %15 {offsets = [0, 0], sizes = [16, 16], strides = [1, 1]} : vector<16x18xf32> to vector<16x16xf32>
    %19 = arith.subf %17, %18 : vector<16x16xf32>
    %20 = vector.extract_strided_slice %16 {offsets = [0, 0], sizes = [16, 16], strides = [1, 1]} : vector<16x18xf32> to vector<16x16xf32>
    %21 = vector.extract_strided_slice %16 {offsets = [0, 1], sizes = [16, 16], strides = [1, 1]} : vector<16x18xf32> to vector<16x16xf32>
    %cst_18 = arith.constant 2.000000e+00 : f32
    %22 = vector.broadcast %cst_18 : f32 to vector<16x16xf32>
    %23 = arith.mulf %22, %21 : vector<16x16xf32>
    %24 = arith.addf %20, %23 : vector<16x16xf32>
    %25 = vector.extract_strided_slice %16 {offsets = [0, 2], sizes = [16, 16], strides = [1, 1]} : vector<16x18xf32> to vector<16x16xf32>
    %26 = arith.addf %24, %25 : vector<16x16xf32>
    %27 = tpu.iota {dimensions = array<i32: 2>} : vector<1x1x4xi32>
    %c0_i32 = arith.constant 0 : i32
    %28 = vector.broadcast %c0_i32 : i32 to vector<1x1x4xi32>
    %29 = arith.cmpi eq, %27, %28 : vector<1x1x4xi32>
    %30 = vector.shape_cast %19 : vector<16x16xf32> to vector<1x16x16xf32>
    %cst_19 = arith.constant dense<0.000000e+00> : vector<1xf32>
    %31 = vector.multi_reduction <add>, %30, %cst_19 [1, 2] : vector<1x16x16xf32> to vector<1xf32>
    %32 = vector.shape_cast %31 : vector<1xf32> to vector<1x1x1xf32>
    %33 = vector.extract %32[0, 0, 0] : f32 from vector<1x1x1xf32>
    %c1_i32 = arith.constant 1 : i32
    %34 = vector.broadcast %c1_i32 : i32 to vector<1x1x4xi32>
    %35 = arith.cmpi eq, %27, %34 : vector<1x1x4xi32>
    %36 = arith.mulf %19, %19 : vector<16x16xf32>
    %37 = vector.shape_cast %36 : vector<16x16xf32> to vector<1x16x16xf32>
    %cst_20 = arith.constant dense<0.000000e+00> : vector<1xf32>
    %38 = vector.multi_reduction <add>, %37, %cst_20 [1, 2] : vector<1x16x16xf32> to vector<1xf32>
    %39 = vector.shape_cast %38 : vector<1xf32> to vector<1x1x1xf32>
    %40 = vector.extract %39[0, 0, 0] : f32 from vector<1x1x1xf32>
    %c2_i32 = arith.constant 2 : i32
    %41 = vector.broadcast %c2_i32 : i32 to vector<1x1x4xi32>
    %42 = arith.cmpi eq, %27, %41 : vector<1x1x4xi32>
    %43 = vector.shape_cast %26 : vector<16x16xf32> to vector<1x16x16xf32>
    %cst_21 = arith.constant dense<0.000000e+00> : vector<1xf32>
    %44 = vector.multi_reduction <add>, %43, %cst_21 [1, 2] : vector<1x16x16xf32> to vector<1xf32>
    %45 = vector.shape_cast %44 : vector<1xf32> to vector<1x1x1xf32>
    %46 = vector.extract %45[0, 0, 0] : f32 from vector<1x1x1xf32>
    %47 = arith.mulf %26, %26 : vector<16x16xf32>
    %48 = vector.shape_cast %47 : vector<16x16xf32> to vector<1x16x16xf32>
    %cst_22 = arith.constant dense<0.000000e+00> : vector<1xf32>
    %49 = vector.multi_reduction <add>, %48, %cst_22 [1, 2] : vector<1x16x16xf32> to vector<1xf32>
    %50 = vector.shape_cast %49 : vector<1xf32> to vector<1x1x1xf32>
    %51 = vector.extract %50[0, 0, 0] : f32 from vector<1x1x1xf32>
    %52 = vector.broadcast %46 : f32 to vector<1x1x4xf32>
    %53 = vector.broadcast %51 : f32 to vector<1x1x4xf32>
    %54 = arith.select %42, %52, %53 : vector<1x1x4xi1>, vector<1x1x4xf32>
    %55 = vector.broadcast %40 : f32 to vector<1x1x4xf32>
    %56 = arith.select %35, %55, %54 : vector<1x1x4xi1>, vector<1x1x4xf32>
    %57 = vector.broadcast %33 : f32 to vector<1x1x4xf32>
    %58 = arith.select %29, %57, %56 : vector<1x1x4xi1>, vector<1x1x4xf32>
    %c0_23 = arith.constant 0 : index
    %c0_24 = arith.constant 0 : index
    %c0_25 = arith.constant 0 : index
    %59 = vector.load %arg2[%c0_23, %c0_24, %c0_25] : memref<1x1x4xf32, #tpu.memory_space<vmem>>, vector<1x1x4xf32>
    tpu.vector_store %arg2[%c0_23, %c0_24, %c0_25], %58 {strides = array<i32>} : memref<1x1x4xf32, #tpu.memory_space<vmem>>, vector<1x1x4xf32>,
    return
  }
  func.func @transform_0(%arg0: i32) -> (i32, i32, i32, i32) {
    %c0_i32 = arith.constant 0 : i32
    %c0_i32_0 = arith.constant 0 : i32
    %c0_i32_1 = arith.constant 0 : i32
    %c0_i32_2 = arith.constant 0 : i32
    return %arg0, %c0_i32, %c0_i32_0, %c0_i32_1 : i32, i32, i32, i32
  }
  func.func @transform_1(%arg0: i32) -> (i32, i32, i32) {
    %c0_i32 = arith.constant 0 : i32
    %c0_i32_0 = arith.constant 0 : i32
    %c0_i32_1 = arith.constant 0 : i32
    return %arg0, %c0_i32, %c0_i32_0 : i32, i32, i32
  }
}

module attributes {stable_mosaic.version = 11 : i64} {
  func.func @_apply_kernel(%arg0: i32, %arg1: memref<4xf32, #tpu.memory_space<smem>>, %arg2: memref<1x1x16x16xf32, #tpu.memory_space<vmem>>, %arg3: memref<1x1x16x16xf32, #tpu.memory_space<vmem>>, %arg4: memref<18x18xf32, #tpu.memory_space<vmem>>) attributes {dimension_semantics = [#tpu.dimension_semantics<parallel>], iteration_bounds = array<i64: 2>, scalar_prefetch = 1 : i64, scratch_operands = 1 : i64, tpu.core_type = #tpu.core_type<tc>, window_params = [{transform_indices = @transform_0, window_bounds = array<i64: 1, 1, 16, 16>}, {transform_indices = @transform_1, window_bounds = array<i64: 1, 1, 16, 16>}]} {
    %c0 = arith.constant 0 : index
    %c0_0 = arith.constant 0 : index
    %c0_1 = arith.constant 0 : index
    %c0_2 = arith.constant 0 : index
    %0 = vector.load %arg2[%c0, %c0_0, %c0_1, %c0_2] : memref<1x1x16x16xf32, #tpu.memory_space<vmem>>, vector<1x1x16x16xf32>
    %1 = vector.shape_cast %0 : vector<1x1x16x16xf32> to vector<16x16xf32>
    %cst = arith.constant 0.000000e+00 : f32
    %2 = vector.broadcast %cst : f32 to vector<1x18xf32>
    %cst_3 = arith.constant 0.000000e+00 : f32
    %3 = vector.broadcast %cst_3 : f32 to vector<18x1xf32>
    %c0_4 = arith.constant 0 : index
    %c0_5 = arith.constant 0 : index
    %4 = vector.load %arg4[%c0_4, %c0_5] : memref<18x18xf32, #tpu.memory_space<vmem>>, vector<1x18xf32>
    tpu.vector_store %arg4[%c0_4, %c0_5], %2 {strides = array<i32>} : memref<18x18xf32, #tpu.memory_space<vmem>>, vector<1x18xf32>,
    %c17 = arith.constant 17 : index
    %c0_6 = arith.constant 0 : index
    %5 = vector.load %arg4[%c17, %c0_6] : memref<18x18xf32, #tpu.memory_space<vmem>>, vector<1x18xf32>
    tpu.vector_store %arg4[%c17, %c0_6], %2 {strides = array<i32>} : memref<18x18xf32, #tpu.memory_space<vmem>>, vector<1x18xf32>,
    %c0_7 = arith.constant 0 : index
    %c0_8 = arith.constant 0 : index
    %6 = vector.load %arg4[%c0_7, %c0_8] : memref<18x18xf32, #tpu.memory_space<vmem>>, vector<18x1xf32>
    tpu.vector_store %arg4[%c0_7, %c0_8], %3 {strides = array<i32>} : memref<18x18xf32, #tpu.memory_space<vmem>>, vector<18x1xf32>,
    %c0_9 = arith.constant 0 : index
    %c17_10 = arith.constant 17 : index
    %7 = vector.load %arg4[%c0_9, %c17_10] : memref<18x18xf32, #tpu.memory_space<vmem>>, vector<18x1xf32>
    tpu.vector_store %arg4[%c0_9, %c17_10], %3 {strides = array<i32>} : memref<18x18xf32, #tpu.memory_space<vmem>>, vector<18x1xf32>,
    %c1 = arith.constant 1 : index
    %c1_11 = arith.constant 1 : index
    %8 = vector.load %arg4[%c1, %c1_11] : memref<18x18xf32, #tpu.memory_space<vmem>>, vector<16x16xf32>
    tpu.vector_store %arg4[%c1, %c1_11], %1 {strides = array<i32>} : memref<18x18xf32, #tpu.memory_space<vmem>>, vector<16x16xf32>,
    %c0_12 = arith.constant 0 : index
    %c0_13 = arith.constant 0 : index
    %9 = vector.load %arg4[%c0_12, %c0_13] : memref<18x18xf32, #tpu.memory_space<vmem>>, vector<16x18xf32>
    %c1_14 = arith.constant 1 : index
    %c0_15 = arith.constant 0 : index
    %10 = vector.load %arg4[%c1_14, %c0_15] : memref<18x18xf32, #tpu.memory_space<vmem>>, vector<16x18xf32>
    %c2 = arith.constant 2 : index
    %c0_16 = arith.constant 0 : index
    %11 = vector.load %arg4[%c2, %c0_16] : memref<18x18xf32, #tpu.memory_space<vmem>>, vector<16x18xf32>
    %cst_17 = arith.constant 2.000000e+00 : f32
    %12 = vector.broadcast %cst_17 : f32 to vector<16x18xf32>
    %13 = arith.mulf %12, %10 : vector<16x18xf32>
    %14 = arith.addf %9, %13 : vector<16x18xf32>
    %15 = arith.addf %14, %11 : vector<16x18xf32>
    %16 = arith.subf %11, %9 : vector<16x18xf32>
    %17 = vector.extract_strided_slice %15 {offsets = [0, 2], sizes = [16, 16], strides = [1, 1]} : vector<16x18xf32> to vector<16x16xf32>
    %18 = vector.extract_strided_slice %15 {offsets = [0, 0], sizes = [16, 16], strides = [1, 1]} : vector<16x18xf32> to vector<16x16xf32>
    %19 = arith.subf %17, %18 : vector<16x16xf32>
    %20 = vector.extract_strided_slice %16 {offsets = [0, 0], sizes = [16, 16], strides = [1, 1]} : vector<16x18xf32> to vector<16x16xf32>
    %21 = vector.extract_strided_slice %16 {offsets = [0, 1], sizes = [16, 16], strides = [1, 1]} : vector<16x18xf32> to vector<16x16xf32>
    %cst_18 = arith.constant 2.000000e+00 : f32
    %22 = vector.broadcast %cst_18 : f32 to vector<16x16xf32>
    %23 = arith.mulf %22, %21 : vector<16x16xf32>
    %24 = arith.addf %20, %23 : vector<16x16xf32>
    %25 = vector.extract_strided_slice %16 {offsets = [0, 2], sizes = [16, 16], strides = [1, 1]} : vector<16x18xf32> to vector<16x16xf32>
    %26 = arith.addf %24, %25 : vector<16x16xf32>
    %c0_19 = arith.constant 0 : index
    %27 = memref.load %arg1[%c0_19] : memref<4xf32, #tpu.memory_space<smem>>
    %28 = vector.broadcast %27 : f32 to vector<16x16xf32>
    %29 = arith.mulf %19, %28 : vector<16x16xf32>
    %c1_20 = arith.constant 1 : index
    %30 = memref.load %arg1[%c1_20] : memref<4xf32, #tpu.memory_space<smem>>
    %31 = vector.broadcast %30 : f32 to vector<16x16xf32>
    %32 = arith.addf %29, %31 : vector<16x16xf32>
    %c2_21 = arith.constant 2 : index
    %33 = memref.load %arg1[%c2_21] : memref<4xf32, #tpu.memory_space<smem>>
    %34 = vector.broadcast %33 : f32 to vector<16x16xf32>
    %35 = arith.mulf %26, %34 : vector<16x16xf32>
    %c3 = arith.constant 3 : index
    %36 = memref.load %arg1[%c3] : memref<4xf32, #tpu.memory_space<smem>>
    %37 = vector.broadcast %36 : f32 to vector<16x16xf32>
    %38 = arith.addf %35, %37 : vector<16x16xf32>
    %39 = arith.mulf %32, %32 : vector<16x16xf32>
    %40 = arith.mulf %38, %38 : vector<16x16xf32>
    %41 = arith.addf %39, %40 : vector<16x16xf32>
    %42 = math.sqrt %41 : vector<16x16xf32>
    %43 = arith.negf %42 : vector<16x16xf32>
    %44 = math.exp %43 : vector<16x16xf32>
    %cst_22 = arith.constant 1.000000e+00 : f32
    %45 = vector.broadcast %cst_22 : f32 to vector<16x16xf32>
    %46 = arith.addf %45, %44 : vector<16x16xf32>
    %47 = arith.divf %45, %46 : vector<16x16xf32>
    %c0_23 = arith.constant 0 : index
    %c0_24 = arith.constant 0 : index
    %c0_25 = arith.constant 0 : index
    %c0_26 = arith.constant 0 : index
    %48 = vector.load %arg3[%c0_23, %c0_24, %c0_25, %c0_26] : memref<1x1x16x16xf32, #tpu.memory_space<vmem>>, vector<1x1x16x16xf32>
    %49 = vector.shape_cast %48 : vector<1x1x16x16xf32> to vector<16x16xf32>
    %50 = vector.shape_cast %47 : vector<16x16xf32> to vector<1x1x16x16xf32>
    tpu.vector_store %arg3[%c0_23, %c0_24, %c0_25, %c0_26], %50 {strides = array<i32>} : memref<1x1x16x16xf32, #tpu.memory_space<vmem>>, vector<1x1x16x16xf32>,
    return
  }
  func.func @transform_0(%arg0: i32, %arg1: memref<4xf32, #tpu.memory_space<smem>>) -> (i32, i32, i32, i32) {
    %c0_i32 = arith.constant 0 : i32
    %c0_i32_0 = arith.constant 0 : i32
    %c0_i32_1 = arith.constant 0 : i32
    %c0_i32_2 = arith.constant 0 : i32
    return %arg0, %c0_i32, %c0_i32_0, %c0_i32_1 : i32, i32, i32, i32
  }
  func.func @transform_1(%arg0: i32, %arg1: memref<4xf32, #tpu.memory_space<smem>>) -> (i32, i32, i32, i32) {
    %c0_i32 = arith.constant 0 : i32
    %c0_i32_0 = arith.constant 0 : i32
    %c0_i32_1 = arith.constant 0 : i32
    %c0_i32_2 = arith.constant 0 : i32
    return %arg0, %c0_i32, %c0_i32_0, %c0_i32_1 : i32, i32, i32, i32
  }
}

</mosaic_0001>

<bundles_post_ra>
// kernel: sobel_forward.2
= control target key start
LH: loop header
LB: loop body
LE: loop exit
PB: predicated region body
PF: predicated region fallthrough
CT: control target
= control target key end

     0   :  { %6 = vsyncpa [#allocation4], 0  ;;  %s603_s0 = inlined_call_operand.hbm [shape: f32[2,1,16,16], index: 0, kind: input, shape index: {}]   ;;  %s604_s1 = inlined_call_operand.vmem [shape: f32[2,1,4], index: 1, kind: output, shape index: {}]  }
   0x1   :  { %8 = vsyncpa [#allocation4 + $0x1], 0  ;;  %s494_s6 = smov 0   ;;  %s496_s7 = smov 0  }
   0x2   :  { %s498_s8 = smov 0   ;;  %s500_s9 = smov 0  }
   0x3 LB: > { %s513_s10 = sadd.s32 4294967295, %s474_s9   ;;  %s516_s11 = sadd.s32 1, %s474_s9   ;;  %s474_s9 = sphi %s500_s9, %s613_s9   ;;  %s470_s8 = sphi %s498_s8, %s612_s8   ;;  %s466_s7 = sphi %s496_s7, %s611_s7   ;;  %s462_s6 = sphi %s494_s6, %s610_s6  }
   0x4   : > { %s18_s12 = ssub.s32 %s474_s9, %s516_s11  ;;  %s21_s13 = sadd.s32 1, %s470_s8 }
   0x5   : > { %p19_p0 = scmp.eq.s32.totalorder %s18_s12, 0  ;;  %p28_p1 = scmp.ne.s32.totalorder %s470_s8, %s466_s7 }
   0x6   : > { %p29_p2 = scmp.eq.s32.totalorder %s474_s9, 0  ;;  %p34_p3 = scmp.ne.s32.totalorder %s466_s7, %s462_s6 }
   0x7   : > { %s526_s14 = scalar_select %p19_p0, %s470_s8, %s21_s13  }
   0x8   : > { %p30_p4 = por %p29_p2, %p28_p1  ;;  %p35_p5 = scmp.eq.s32.totalorder %s513_s10, 0 }
   0x9   : > { %p372_p6 = scmp.lt.s32.totalorder %s474_s9, 2  ;;  %s84_s16 = sand.u32 1, %s470_s8  }
   0xa   : > { %p530_p7 = por %p35_p5, %p34_p3  ;;  %s350_s17 = sshll.u32 %s84_s16, 4 }
   0xb   : > { %s357_s18 = sshll.u32 %s474_s9, 8  ;;  %s88_s22 = scalar_lea.vmem [#allocation3], %s350_s17 }
   0xc   : > { %s606_s15 = scalar_select %p530_p7, 1, 0 }
   0xd   : > { %s539_s21 = scalar_lea.hbm %s603_s0, %s357_s18  ;;  %s95_s23 = sshll.u32 %s88_s22, 4  ;;  %s541_s23 = int_to_ptr.vmem [resolvable:$true] %s95_s23 }
   0xe   : > { %p543_p8 = pnand %p372_p6, %p30_p4  ;;  %s548_s25 = scalar_lea.sflag [#allocation4], %s84_s16 }
   0xf   : > { %s412_s26 = scalar_lea.hbm %s539_s21, 256  ;;  %s417_s29 = scalar_lea.hbm %s603_s0, 512 }
  0x10   : > { %p413_p10 = scmp.ne.s32.totalorder %s539_s21, %s412_s26  ;;  %p414_p11 = pneg %p543_p8 }
  0x11   : > { %p418_p0 = scmp.lt.s32.totalorder %s539_s21, %s603_s0  ;;  %p419_p1 = scmp.lt.s32.totalorder %s417_s29, %s412_s26 }
  0x12   : > { %p415_p12 = pnand %p414_p11, %p413_p10 }
  0x13   : > { %p420_p2 = por %p419_p1, %p418_p0 }
  0x14   : > { %p416_p13 = pneg %p415_p12 }
  0x16   : > { %p421_p3 = pnand %p420_p2, %p416_p13 }
  0x18   : > { %424 = shalt.err (!%p421_p3)
}
  0x19   : > { %s425_s3 = scalar_lea.vmem %s541_s23, 256  ;;  %s476_s4 = smov [#allocation3]  }
  0x1a   : > { %p426_p4 = scmp.ne.s32.totalorder %s541_s23, %s425_s3  ;;  %s430_s5 = sshll.u32 %s476_s4, 4  ;;  %s431_s5 = int_to_ptr.vmem [resolvable:$false] %s430_s5 }
  0x1b   : > { %s432_s6 = scalar_lea.vmem %s431_s5, 512  ;;  %p433_p10 = scmp.lt.s32.totalorder %s541_s23, %s431_s5 }
  0x1c   : > { %p428_p5 = pnand %p426_p4, %p414_p11  ;;  %p434_p12 = scmp.lt.s32.totalorder %s432_s6, %s425_s3 }
  0x1e   : > { %p429_p6 = pneg %p428_p5  ;;  %p435_p9 = por %p434_p12, %p433_p10 }
  0x20   : > { %p436_p7 = pnand %p435_p9, %p429_p6 }
  0x22   : > { %439 = shalt.err (!%p436_p7)
}
  0x23   : > { %s477_s12 = smov 128   ;;  %s478_s13 = smov 8  }
  0x24   : > { %371 = dma.hbm_to_vmem [thread:$0]  (!%p543_p8), %s539_s21, 256, %s541_s23, %s548_s25, %s477_s12, %s477_s12, %s478_s13  }
  0x25   : > { %p103_p11 = scmp.lt.s32.totalorder %s474_s9, 3  ;;  %p608_p13 = scmp.ge.s32.totalorder %s474_s9, 1 }
  0x27   : > { %p104_p0 = pnand %p608_p13, %p103_p11 }
  0x28   : > { %s109_s16 = sand.u32 (!%p104_p0), 1, %s466_s7   ;;  %p609_p7 = scmp.ne.s32.totalorder (!%p104_p0), %s606_s15, 0 }
  0x29   : > { %107 = sbr.rel (%p104_p0) target bundleno = 632 (0x278), region = 24  ;;  %s354_s17 = sshll.u32 (!%p104_p0), %s109_s16, 4 }
  0x2a   : > { %s110_s18 = scalar_lea.sflag (!%p104_p0), [#allocation4], %s109_s16  ;;  %s113_s19 = scalar_lea.vmem (!%p104_p0), [#allocation3], %s354_s17 }
  0x2e   : > { %457 = dma.done.wait (%p609_p7), %s110_s18, 256  }
  0x2f   : > { %459 = vsyncadd (%p609_p7), %s110_s18, 4294967040  ;;  %vm135_vm0 = vcmask 139264   ;;  %vm138_vm1 = vcmask 7168   ;;  %vm143_vm2 = vcmask 146568   ;;  %v479_v0 = vmov 0.0   ;;  %v133_v1 = vld [vmem:[%s113_s19] sm:$0xff] }
  0x30   : > { %136 = vst.msk [vmem:[#allocation2] sm:$0x1] %vm135_vm0, %v479_v0  ;;  %137 = vst.msk [vmem:[#allocation2 + $0x11] sm:$0x1] %vm135_vm0, %v479_v0  ;;  %vm141_vm3 = vcmask 1024   ;;  %vm146_vm4 = vcmask 140424  }
  0x31   : > { %140 = vst.msk [vmem:[#allocation2 + $0x8] sm:$0xff] %vm138_vm1, %v479_v0  ;;  %139 = vst.msk [vmem:[#allocation2] sm:$0xff] %vm138_vm1, %v479_v0  ;;  %s480_s9 = smov 1   ;;  %v134_v2 = vld [vmem:[%s113_s19 + $0x8] sm:$0xff]  ;;  %vm156_vm5 = vcmask 138248   ;;  %s481_s15 = smov 2  }
  0x32   : > { %145 = vst.msk [vmem:[#allocation2 + $0x8] sm:$0xff] %vm143_vm2, %v479_v0  ;;  %144 = vst.msk [vmem:[#allocation2] sm:$0xff] %vm143_vm2, %v479_v0  ;;  %150 = vrot.lane.b32.xlu0 %v133_v1, %s480_s9  ;;  %s482_s20 = smov 127   ;;  %s483_s21 = smov 126   ;;  %vm216_vm6 = vcmask 130048   ;;  %vm286_vm10 = vcmask 24576  }
  0x33   : > { %142 = vst.msk [vmem:[#allocation2 + $0x10] sm:$0x3] %vm141_vm3, %v479_v0  ;;  %p130_p8 = scmp.lt.s32.totalorder %s513_s10, 1 }
  0x34   : > { %147 = vst.msk [vmem:[#allocation2 + $0x10] sm:$0x3] %vm146_vm4, %v479_v0 }
  0x35   : > { %s615_s10 = smov (!%p130_p8, %s513_s10), 1 }
  0x36   : > { %152 = vrot.lane.b32.xlu0 %v134_v2, %s480_s9  ;;  %s132_s28 = scalar_lea.vmem %s604_s1, %s615_s10 }
  0xa4   : > { %v151_v3 = vpop.permute.xlu0 %150 }
  0xa5   : > { %157 = vst.msk [vmem:[#allocation2 + $0x1] sm:$0xff] %vm156_vm5, %v151_v3 }
  0xa8   : > { %v153_v4 = vpop.permute.xlu0 %152 }
  0xa9   : > { %158 = vst.msk [vmem:[#allocation2 + $0x9] sm:$0xff] %vm156_vm5, %v153_v4 }
  0xac   : > { %v161_v5 = vld [vmem:[#allocation2 + $0x1] sm:$0xff] }
  0xad   : > { %v165_v6 = vmul.f32 2.0, %v161_v5  ;;  %v159_v7 = vld [vmem:[#allocation2] sm:$0xff] }
  0xaf   : > { %v167_v8 = vadd.f32 %v165_v6, %v159_v7 }
  0xb0   : > { %v163_v9 = vld [vmem:[#allocation2 + $0x2] sm:$0xff]  ;;  %v164_v15 = vld [vmem:[#allocation2 + $0xa] sm:$0xff] }
  0xb1   : > { %v162_v10 = vld [vmem:[#allocation2 + $0x9] sm:$0xff]  ;;  %v169_v11 = vadd.f32 %v167_v8, %v163_v9  ;;  %v171_v12 = vsub.f32 %v163_v9, %v159_v7 }
  0xb2   : > { %v166_v13 = vmul.f32 2.0, %v162_v10  ;;  %v160_v14 = vld [vmem:[#allocation2 + $0x8] sm:$0xff] }
  0xb3   : > { %175 = vrot.lane.b32.xlu1 %v169_v11, %s481_s15  ;;  %v183_v16 = vmul.f32 2.0, %v171_v12  ;;  %v172_v19 = vsub.f32 %v164_v15, %v160_v14 }
  0xb4   : > { %v168_v17 = vadd.f32 %v166_v13, %v160_v14 }
  0xb5   : > { %187 = vrot.lane.b32.xlu0 %v183_v16, %s482_s20  ;;  %v184_v20 = vmul.f32 2.0, %v172_v19 }
  0xb6   : > { %v170_v18 = vadd.f32 %v168_v17, %v164_v15  ;;  %v205_v17 = vlaneseq }
  0xb8   : > { %177 = vrot.lane.b32.xlu1 %v170_v18, %s481_s15 }
  0xb9   : > { %197 = vrot.lane.b32.xlu0 %v171_v12, %s483_s21 }
  0xbc   : > { %189 = vrot.lane.b32.xlu1 %v184_v20, %s482_s20 }
  0xc0   : > { %199 = vrot.lane.b32.xlu1 %v172_v19, %s483_s21 }
 0x125   : > { %v176_v21 = vpop.permute.xlu1 %175 }
 0x126   : > { %v181_v22 = vsub.f32 %v169_v11, %v176_v21 }
 0x127   : > { %v188_v27 = vpop.permute.xlu0 %187 }
 0x128   : > { %210 = vrot.lane.b32.xlu0 %v181_v22, %s483_s21  ;;  %v230_v24 = vmul.f32 %v181_v22, %v181_v22  ;;  %v193_v33 = vadd.f32 %v188_v27, %v171_v12 }
 0x12a   : > { %v178_v23 = vpop.permute.xlu1 %177 }
 0x12b   : > { %v182_v25 = vsub.f32 %v170_v18, %v178_v23  ;;  %v198_v29 = vpop.permute.xlu0 %197  ;;  %v206_v18 = vand.u32 127, %v205_v17 }
 0x12c   : > { %234 = vrot.lane.b32.xlu0 %v230_v24, %s483_s21  ;;  %v203_v36 = vadd.f32 %v198_v29, %v193_v33 }
 0x12d   : > { %212 = vrot.lane.b32.xlu1 %v182_v25, %s483_s21  ;;  %v231_v26 = vmul.f32 %v182_v25, %v182_v25  ;;  %vm252_vm7 = vcmp.eq.s32.totalorder %v206_v18, 2  ;;  %vm229_vm8 = vcmp.eq.s32.totalorder %v206_v18, 1  ;;  %vm207_vm9 = vcmp.eq.s32.totalorder %v206_v18, 0 }
 0x12e   : > { %v190_v28 = vpop.permute.xlu1 %189  ;;  %v265_v44 = vmul.f32 %v203_v36, %v203_v36  ;;  %v253_v47 = vsel %vm216_vm6, %v203_v36, 0.0 }
 0x12f   : > { %v194_v32 = vadd.f32 %v190_v28, %v172_v19 }
 0x130   : > { %v267_v51 = vsel %vm216_vm6, %v265_v44, 0.0 }
 0x131   : > { %236 = vrot.lane.b32.xlu1 %v231_v26, %s483_s21 }
 0x132   : > { %v200_v30 = vpop.permute.xlu1 %199 }
 0x133   : > { %v204_v34 = vadd.f32 %v200_v30, %v194_v32 }
 0x135   : > { %v266_v41 = vmul.f32 %v204_v34, %v204_v34  ;;  %v254_v42 = vsel %vm216_vm6, %v204_v34, 0.0 }
 0x136   : > { %v255_v48 = vadd.f32 %v254_v42, %v253_v47 }
 0x137   : > { %v268_v50 = vsel %vm216_vm6, %v266_v41, 0.0 }
 0x138   : > { %v269_v52 = vadd.f32 %v268_v50, %v267_v51 }
 0x19a   : > { %v211_v31 = vpop.permute.xlu0 %210 }
 0x19b   : > { %v217_v37 = vsel %vm216_vm6, %v211_v31, 0.0 }
 0x19e   : > { %v235_v39 = vpop.permute.xlu0 %234 }
 0x19f   : > { %v213_v35 = vpop.permute.xlu1 %212  ;;  %v240_v45 = vsel %vm216_vm6, %v235_v39, 0.0 }
 0x1a0   : > { %v218_v38 = vsel %vm216_vm6, %v213_v35, 0.0 }
 0x1a1   : > { %v219_v40 = vadd.f32 %v218_v38, %v217_v37 }
 0x1a3   : > { %220 = vadd.xlane.f32.xlu0 %v219_v40  ;;  %v237_v43 = vpop.permute.xlu1 %236 }
 0x1a4   : > { %v241_v46 = vsel %vm216_vm6, %v237_v43, 0.0 }
 0x1a5   : > { %v242_v49 = vadd.f32 %v241_v46, %v240_v45 }
 0x1a7   : > { %256 = vadd.xlane.f32.xlu0 %v255_v48  ;;  %243 = vadd.xlane.f32.xlu1 %v242_v49 }
 0x1ab   : > { %270 = vadd.xlane.f32.xlu0 %v269_v52 }
 0x22c   : > { %v221_v53 = vpop.xlane.xlu0 %220 }
 0x22d   : > { %v222_v54 = vrot.slane %v221_v53, 4 }
 0x22f   : > { %v223_v55 = vadd.f32 %v222_v54, %v221_v53 }
 0x230   : > { %v257_v56 = vpop.xlane.xlu0 %256  ;;  %v244_v57 = vpop.xlane.xlu1 %243 }
 0x231   : > { %v224_v58 = vrot.slane %v223_v55, 2  ;;  %v258_v59 = vrot.slane %v257_v56, 4  ;;  %v245_v60 = vrot.slane %v244_v57, 4 }
 0x233   : > { %v259_v61 = vadd.f32 %v258_v59, %v257_v56  ;;  %v246_v62 = vadd.f32 %v245_v60, %v244_v57  ;;  %v225_v63 = vadd.f32 %v224_v58, %v223_v55 }
 0x234   : > { %v271_v0 = vpop.xlane.xlu0 %270 }
 0x235   : > { %v260_v1 = vrot.slane %v259_v61, 2  ;;  %v247_v2 = vrot.slane %v246_v62, 2  ;;  %v272_v3 = vrot.slane %v271_v0, 4  ;;  %v226_v4 = vrot.slane %v225_v63, 1 }
 0x237   : > { %v248_v5 = vadd.f32 %v247_v2, %v246_v62  ;;  %v273_v6 = vadd.f32 %v272_v3, %v271_v0  ;;  %v227_v7 = vadd.f32 %v226_v4, %v225_v63  ;;  %v261_v8 = vadd.f32 %v260_v1, %v259_v61 }
 0x239   : > { %v274_v9 = vrot.slane %v273_v6, 2  ;;  %358 = vpush %v227_v7  ;;  %v249_v10 = vrot.slane %v248_v5, 1  ;;  %v262_v11 = vrot.slane %v261_v8, 1 }
 0x23b   : > { %v275_v12 = vadd.f32 %v274_v9, %v273_v6  ;;  %v250_v13 = vadd.f32 %v249_v10, %v248_v5  ;;  %v263_v14 = vadd.f32 %v262_v11, %v261_v8 }
 0x23d   : > { %360 = vpush %v250_v13  ;;  %v276_v15 = vrot.slane %v275_v12, 1 }
 0x23e   : > { %362 = vpush %v263_v14 }
 0x23f   : > { %v277_v16 = vadd.f32 %v276_v15, %v275_v12 }
 0x241   : > { %364 = vpush %v277_v16 }
 0x26a   : > { %s359_s22 = spop %358 }
 0x26b   : > { %v284_v23 = vstv %s359_s22 }
 0x26e   : > { %s361_s23 = spop %360 }
 0x26f   : > { %s363_s24 = spop %362  ;;  %v282_v21 = vstv %s361_s23 }
 0x270   : > { %v279_v19 = vstv %s363_s24 }
 0x272   : > { %s365_s25 = spop %364 }
 0x273   : > { %v280_v20 = vstv %s365_s25 }
 0x274   : > { %v281_v22 = vsel %vm252_vm7, %v279_v19, %v280_v20 }
 0x275   : > { %v283_v24 = vsel %vm229_vm8, %v282_v21, %v281_v22 }
 0x276   : > { %v285_v25 = vsel %vm207_vm9, %v284_v23, %v283_v24 }
 0x277   : > { %287 = vst.msk [vmem:[%s132_s28] sm:$0x1] %vm286_vm10, %v285_v25 }
 0x278 PF: > { %p11_p9 = scmp.ge.s32.totalorder %s516_s11, 4   ;;  %s610_s6 = smov %s466_s7 }
 0x279   : > { %s611_s7 = smov %s470_s8  ;;  %s612_s8 = smov %s526_s14 }
 0x27a   : > { %s613_s9 = smov %s516_s11  ;;  %13 = sbr.rel (!%p11_p9) target bundleno = 3 (0x3), region = 64 }
 0x27f   :  { %305 = vsyncpa [#allocation4], 1 }
 0x280   :  { %307 = vsyncpa [#allocation4 + $0x1], 1 }

// kernel: sobel_forward.3
= control target key start
LH: loop header
LB: loop body
LE: loop exit
PB: predicated region body
PF: predicated region fallthrough
CT: control target
= control target key end

     0   :  { %s624_s0 = inlined_call_operand.vmem [shape: f32[4], index: 0, kind: input, shape index: {}]   ;;  %s625_s1 = inlined_call_operand.vmem [shape: f32[2,1,16,16], index: 1, kind: input, shape index: {}]   ;;  %s626_s2 = inlined_call_operand.hbm [shape: f32[2,1,16,16], index: 2, kind: output, shape index: {}]  }
   0x1   :  { %s7_s11 = sshll.u32 %s624_s0, 4  ;;  %s8_s11 = int_to_ptr.vmem [resolvable:$true] %s7_s11 }
   0x2   :  { %s415_s12 = scalar_lea.vmem %s8_s11, 16  ;;  %p420_p1 = scmp.lt.s32.totalorder %s8_s11, %s8_s11 }
   0x3   :  { %p416_p0 = scmp.ne.s32.totalorder %s8_s11, %s415_s12  ;;  %p421_p2 = scmp.lt.s32.totalorder %s415_s12, %s415_s12 }
   0x5   :  { %p422_p3 = por %p421_p2, %p420_p1 }
   0x7   :  { %p423_p4 = pnand %p422_p3, %p416_p0 }
   0x9   :  { %426 = shalt.err (!%p423_p4)  }
   0xa   :  { %s491_s13 = smov [#allocation4]  }
   0xb   :  { %10 = dma.vmem_to_smem %s8_s11, 16, %s491_s13, [#allocation3] }
   0xc   :  { %469 = dma.done.wait [#allocation3], 16 }
   0xd   :  { %470 = vsyncadd [#allocation3], 4294967280 }
   0xe   :  { %12 = sfence }
   0xf   :  { %13 = vsyncpa [#allocation6], 0 }
  0x10   :  { %15 = vsyncpa [#allocation6 + $0x1], 0  ;;  %s518_s14 = smov 0   ;;  %s520_s15 = smov 0  }
  0x11   :  { %s522_s0 = smov 0   ;;  %s524_s16 = smov 0  }
  0x12 LB: > { %s539_s17 = sadd.s32 4294967295, %s489_s16   ;;  %s337_s18 = sadd.s32 4294967294, %s489_s16   ;;  %s489_s16 = sphi %s524_s16, %s632_s16   ;;  %s485_s0 = sphi %s522_s0, %s631_s0   ;;  %s481_s15 = sphi %s520_s15, %s630_s15   ;;  %s477_s14 = sphi %s518_s14, %s629_s14  }
  0x13   : > { %s543_s19 = sadd.s32 1, %s489_s16   ;;  %s54_s20 = sadd.s32 1, %s485_s0 }
  0x14   : > { %s51_s21 = ssub.s32 %s489_s16, %s543_s19  ;;  %p64_p5 = scmp.ne.s32.totalorder %s485_s0, %s481_s15 }
  0x15   : > { %p52_p6 = scmp.eq.s32.totalorder %s51_s21, 0  ;;  %p65_p7 = scmp.eq.s32.totalorder %s539_s17, 1 }
  0x16   : > { %p70_p8 = scmp.ne.s32.totalorder %s481_s15, %s477_s14  ;;  %p71_p9 = scmp.eq.s32.totalorder %s337_s18, 1 }
  0x17   : > { %s554_s22 = scalar_select %p52_p6, %s485_s0, %s54_s20  }
  0x18   : > { %p556_p10 = por %p65_p7, %p64_p5  ;;  %p560_p11 = por %p71_p9, %p70_p8 }
  0x19   : > { %p340_p12 = scmp.ge.s32.totalorder %s489_s16, 1  ;;  %p97_p13 = scmp.lt.s32.totalorder %s489_s16, 3 }
  0x1b   : > { %p98_p0 = pnand %p340_p12, %p97_p13 }
  0x1c   : > { %p117_p1 = scmp.lt.s32.totalorder (!%p98_p0), %s539_s17, 1  ;;  %s493_s30 = smov (!%p98_p0), 1  }
  0x1d   : > { %101 = sbr.rel (%p98_p0) target bundleno = 597 (0x255), region = 24  ;;  %s494_s3 = smov (!%p98_p0), 126  }
  0x1e   : > { %s495_s4 = smov (!%p98_p0), 127   ;;  %s496_s5 = smov (!%p98_p0), 2  }
  0x1f   : > { %s345_s6 = sld [smem:[#allocation4 + $0x2]] (!%p98_p0)  ;;  %s114_s10 = sand.u32 (!%p98_p0), 1, %s481_s15  }
  0x20   : > { %s346_s7 = sld [smem:[#allocation4 + $0x3]] (!%p98_p0)  ;;  %s341_s11 = sshll.u32 (!%p98_p0), %s114_s10, 4 }
  0x21   : > { %s194_s8 = sld [smem:[#allocation4]] (!%p98_p0)  ;;  %s116_s12 = scalar_lea.vmem (!%p98_p0), [#allocation5], %s341_s11 }
  0x22   : > { %vm124_vm0 = vcmask 139264   ;;  %vm127_vm1 = vcmask 7168   ;;  %vm132_vm2 = vcmask 146568   ;;  %v492_v0 = vmov 0.0   ;;  %s118_s25 = scalar_select %p117_p1, %s539_s17, 1 }
  0x23   : > { %125 = vst.msk [vmem:[#allocation2] sm:$0x1] %vm124_vm0, %v492_v0  ;;  %126 = vst.msk [vmem:[#allocation2 + $0x11] sm:$0x1] %vm124_vm0, %v492_v0  ;;  %vm130_vm3 = vcmask 1024   ;;  %vm135_vm4 = vcmask 140424  }
  0x24   : > { %129 = vst.msk [vmem:[#allocation2 + $0x8] sm:$0xff] %vm127_vm1, %v492_v0  ;;  %128 = vst.msk [vmem:[#allocation2] sm:$0xff] %vm127_vm1, %v492_v0  ;;  %s354_s26 = sshll.u32 %s118_s25, 4  ;;  %vm145_vm5 = vcmask 138248   ;;  %s344_s9 = sld [smem:[#allocation4 + $0x1]]  ;;  %vm258_vm10 = vcmask 130048  }
  0x25   : > { %134 = vst.msk [vmem:[#allocation2 + $0x8] sm:$0xff] %vm132_vm2, %v492_v0  ;;  %133 = vst.msk [vmem:[#allocation2] sm:$0xff] %vm132_vm2, %v492_v0  ;;  %s121_s29 = scalar_lea.vmem %s625_s1, %s354_s26  ;;  %v203_v24 = vstv %s345_s6  ;;  %s275_s13 = sshll.u32 %s116_s12, 4  ;;  %s577_s13 = int_to_ptr.vmem [resolvable:$true] %s275_s13 }
  0x26   : > { %131 = vst.msk [vmem:[#allocation2 + $0x10] sm:$0x3] %vm130_vm3, %v492_v0  ;;  %v122_v1 = vld [vmem:[%s121_s29] sm:$0xff]  ;;  %v123_v2 = vld [vmem:[%s121_s29 + $0x8] sm:$0xff]  ;;  %v207_v27 = vstv %s346_s7  ;;  %s355_s18 = sshll.u32 %s539_s17, 8  ;;  %s584_s26 = scalar_lea.sflag [#allocation6], %s114_s10 }
  0x27   : > { %136 = vst.msk [vmem:[#allocation2 + $0x10] sm:$0x3] %vm135_vm4, %v492_v0  ;;  %139 = vrot.lane.b32.xlu0 %v122_v1, %s493_s30  ;;  %v195_v39 = vstv %s194_s8  ;;  %s582_s25 = scalar_lea.hbm %s626_s2, %s355_s18  ;;  %s427_s27 = scalar_lea.vmem %s577_s13, 256 }
  0x28   : > { %p428_p2 = scmp.ne.s32.totalorder %s577_s13, %s427_s27  ;;  %s497_s17 = smov [#allocation5]  }
  0x29   : > { %s431_s28 = sshll.u32 %s497_s17, 4  ;;  %s432_s28 = int_to_ptr.vmem [resolvable:$false] %s431_s28 }
  0x2a   : > { %v199_v42 = vstv %s344_s9  ;;  %p429_p3 = pnand %p428_p2, %p556_p10  ;;  %s433_s29 = scalar_lea.vmem %s432_s28, 512 }
  0x2b   : > { %141 = vrot.lane.b32.xlu0 %v123_v2, %s493_s30  ;;  %p434_p5 = scmp.lt.s32.totalorder %s577_s13, %s432_s28  ;;  %p435_p6 = scmp.lt.s32.totalorder %s433_s29, %s427_s27 }
  0x2c   : > { %p430_p4 = pneg %p429_p3 }
  0x2d   : > { %p436_p7 = por %p435_p6, %p434_p5 }
  0x2f   : > { %p437_p8 = pnand %p436_p7, %p430_p4 }
  0x99   : > { %v140_v3 = vpop.permute.xlu0 %139 }
  0x9a   : > { %146 = vst.msk [vmem:[#allocation2 + $0x1] sm:$0xff] %vm145_vm5, %v140_v3 }
  0x9d   : > { %v142_v4 = vpop.permute.xlu0 %141 }
  0x9e   : > { %147 = vst.msk [vmem:[#allocation2 + $0x9] sm:$0xff] %vm145_vm5, %v142_v4 }
  0xa1   : > { %v150_v5 = vld [vmem:[#allocation2 + $0x1] sm:$0xff] }
  0xa2   : > { %v154_v6 = vmul.f32 2.0, %v150_v5  ;;  %v148_v7 = vld [vmem:[#allocation2] sm:$0xff] }
  0xa4   : > { %v156_v12 = vadd.f32 %v154_v6, %v148_v7 }
  0xa5   : > { %v152_v8 = vld [vmem:[#allocation2 + $0x2] sm:$0xff]  ;;  %v153_v10 = vld [vmem:[#allocation2 + $0xa] sm:$0xff] }
  0xa6   : > { %v149_v9 = vld [vmem:[#allocation2 + $0x8] sm:$0xff]  ;;  %v160_v11 = vsub.f32 %v152_v8, %v148_v7  ;;  %v158_v16 = vadd.f32 %v156_v12, %v152_v8 }
  0xa7   : > { %v161_v14 = vsub.f32 %v153_v10, %v149_v9  ;;  %v151_v15 = vld [vmem:[#allocation2 + $0x9] sm:$0xff] }
  0xa8   : > { %186 = vrot.lane.b32.xlu0 %v160_v11, %s494_s3  ;;  %v172_v13 = vmul.f32 2.0, %v160_v11  ;;  %v155_v18 = vmul.f32 2.0, %v151_v15 }
  0xa9   : > { %v173_v17 = vmul.f32 2.0, %v161_v14 }
  0xaa   : > { %176 = vrot.lane.b32.xlu1 %v172_v13, %s495_s4  ;;  %v157_v19 = vadd.f32 %v155_v18, %v149_v9 }
  0xac   : > { %164 = vrot.lane.b32.xlu0 %v158_v16, %s496_s5  ;;  %v159_v20 = vadd.f32 %v157_v19, %v153_v10 }
  0xae   : > { %178 = vrot.lane.b32.xlu1 %v173_v17, %s495_s4 }
  0xb2   : > { %188 = vrot.lane.b32.xlu1 %v161_v14, %s494_s3 }
  0xb6   : > { %166 = vrot.lane.b32.xlu1 %v159_v20, %s496_s5 }
 0x11a   : > { %v187_v23 = vpop.permute.xlu0 %186 }
 0x11c   : > { %v177_v21 = vpop.permute.xlu1 %176 }
 0x11d   : > { %v182_v22 = vadd.f32 %v177_v21, %v160_v11 }
 0x11e   : > { %v165_v37 = vpop.permute.xlu0 %164 }
 0x11f   : > { %v192_v25 = vadd.f32 %v187_v23, %v182_v22  ;;  %v170_v38 = vsub.f32 %v158_v16, %v165_v37 }
 0x120   : > { %v179_v26 = vpop.permute.xlu1 %178 }
 0x121   : > { %v204_v28 = vmul.f32 %v203_v24, %v192_v25  ;;  %v183_v29 = vadd.f32 %v179_v26, %v161_v14  ;;  %v196_v41 = vmul.f32 %v195_v39, %v170_v38 }
 0x123   : > { %v208_v30 = vadd.f32 %v207_v27, %v204_v28  ;;  %v200_v44 = vadd.f32 %v199_v42, %v196_v41 }
 0x124   : > { %v189_v31 = vpop.permute.xlu1 %188 }
 0x125   : > { %v193_v32 = vadd.f32 %v189_v31, %v183_v29  ;;  %v212_v33 = vmul.f32 %v208_v30, %v208_v30  ;;  %v210_v46 = vmul.f32 %v200_v44, %v200_v44 }
 0x127   : > { %v205_v34 = vmul.f32 %v203_v24, %v193_v32  ;;  %216 = vrot.lane.b32.xlu0 %v212_v33, %s496_s5 }
 0x128   : > { %v167_v40 = vpop.permute.xlu1 %166 }
 0x129   : > { %v209_v35 = vadd.f32 %v207_v27, %v205_v34  ;;  %v171_v43 = vsub.f32 %v159_v20, %v167_v40 }
 0x12b   : > { %v213_v36 = vmul.f32 %v209_v35, %v209_v35  ;;  %v197_v45 = vmul.f32 %v195_v39, %v171_v43 }
 0x12d   : > { %218 = vrot.lane.b32.xlu1 %v213_v36, %s496_s5  ;;  %v201_v49 = vadd.f32 %v199_v42, %v197_v45 }
 0x12f   : > { %v211_v50 = vmul.f32 %v201_v49, %v201_v49 }
 0x199   : > { %v217_v47 = vpop.permute.xlu0 %216 }
 0x19a   : > { %v222_v48 = vadd.f32 %v217_v47, %v210_v46 }
 0x19c   : > { %403 = vrsqrt.f32 %v222_v48  ;;  %vm226_vm6 = vcmp.eq.f32.partialorder %v222_v48, inf  ;;  %v229_v55 = vand.u32 2147483648, %v222_v48  ;;  %vm228_vm7 = vcmp.eq.f32.partialorder %v222_v48, 0.0 }
 0x19f   : > { %v219_v51 = vpop.permute.xlu1 %218 }
 0x1a0   : > { %v223_v52 = vadd.f32 %v219_v51, %v211_v50 }
 0x1a2   : > { %405 = vrsqrt.f32 %v223_v52  ;;  %vm233_vm8 = vcmp.eq.f32.partialorder %v223_v52, inf  ;;  %v236_v61 = vand.u32 2147483648, %v223_v52  ;;  %vm235_vm9 = vcmp.eq.f32.partialorder %v223_v52, 0.0 }
 0x1a9   : > { %v404_v53 = vpop.eup %403 }
 0x1aa   : > { %v225_v54 = vmul.f32 %v404_v53, %v222_v48 }
 0x1ac   : > { %v227_v56 = vsel %vm226_vm6, %v222_v48, %v225_v54 }
 0x1ad   : > { %v230_v57 = vsel %vm228_vm7, %v229_v55, %v227_v56 }
 0x1ae   : > { %v347_v58 = vmul.f32 -1.442695, %v230_v57 }
 0x1af   : > { %v406_v59 = vpop.eup %405 }
 0x1b0   : > { %407 = vpow2.f32 %v347_v58  ;;  %v232_v60 = vmul.f32 %v406_v59, %v223_v52 }
 0x1b2   : > { %v234_v62 = vsel %vm233_vm8, %v223_v52, %v232_v60 }
 0x1b3   : > { %v237_v63 = vsel %vm235_vm9, %v236_v61, %v234_v62 }
 0x1b4   : > { %v348_v0 = vmul.f32 -1.442695, %v237_v63 }
 0x1b6   : > { %409 = vpow2.f32 %v348_v0 }
 0x1bd   : > { %v408_v1 = vpop.eup %407 }
 0x1be   : > { %v244_v2 = vadd.f32 1.0, %v408_v1 }
 0x1c0   : > { %411 = vrcp.f32 %v244_v2 }
 0x1c3   : > { %v410_v3 = vpop.eup %409 }
 0x1c4   : > { %v245_v4 = vadd.f32 1.0, %v410_v3 }
 0x1c6   : > { %413 = vrcp.f32 %v245_v4 }
 0x1cd   : > { %v412_v5 = vpop.eup %411 }
 0x1ce   : > { %252 = vrot.lane.b32.xlu0 %v412_v5, %s494_s3 }
 0x1d3   : > { %v414_v6 = vpop.eup %413 }
 0x1d4   : > { %254 = vrot.lane.b32.xlu1 %v414_v6, %s494_s3 }
 0x240   : > { %v253_v7 = vpop.permute.xlu0 %252 }
 0x241   : > { %259 = vst.msk [vmem:[%s116_s12] sm:$0xff] %vm258_vm10, %v253_v7 }
 0x246   : > { %v255_v8 = vpop.permute.xlu1 %254 }
 0x247   : > { %260 = vst.msk [vmem:[%s116_s12 + $0x8] sm:$0xff] %vm258_vm10, %v255_v8 }
 0x248   : > { %440 = shalt.err (!%p437_p8)
}
 0x249   : > { %s441_s30 = scalar_lea.hbm %s582_s25, 256  ;;  %s445_s5 = scalar_lea.hbm %s626_s2, 512 }
 0x24a   : > { %p442_p9 = scmp.ne.s32.totalorder %s582_s25, %s441_s30  ;;  %p446_p0 = scmp.lt.s32.totalorder %s582_s25, %s626_s2 }
 0x24b   : > { %p447_p1 = scmp.lt.s32.totalorder %s445_s5, %s441_s30 }
 0x24c   : > { %p443_p12 = pnand %p442_p9, %p556_p10 }
 0x24d   : > { %p448_p2 = por %p447_p1, %p446_p0 }
 0x24e   : > { %p444_p13 = pneg %p443_p12 }
 0x250   : > { %p449_p3 = pnand %p448_p2, %p444_p13 }
 0x252   : > { %452 = shalt.err (!%p449_p3)
}
 0x253   : > { %s498_s8 = smov 128   ;;  %s499_s9 = smov 8  }
 0x254   : > { %356 = dma.vmem_to_hbm [thread:$0]  (%p556_p10), %s577_s13, 256, %s582_s25, %s584_s26, %s498_s8, %s498_s8, %s499_s9  }
 0x255 PF: > { %p362_p4 = scmp.ge.s32.totalorder %s489_s16, 2  ;;  %s290_s10 = sand.u32 1, %s477_s14  }
 0x256   : > { %s291_s11 = scalar_lea.sflag [#allocation6], %s290_s10 }
 0x257   : > { %p359_p5 = pnand %p362_p4, %p560_p11 }
 0x259   : > { %p360_p6 = pneg %p359_p5 }
 0x25b   : > { %472 = dma.done.wait (%p360_p6), %s291_s11, 256  }
 0x25c   : > { %474 = vsyncadd (%p360_p6), %s291_s11, 4294967040  ;;  %p18_p7 = scmp.ge.s32.totalorder %s543_s19, 4   ;;  %s629_s14 = smov %s481_s15 }
 0x25d   : > { %s630_s15 = smov %s485_s0  ;;  %s631_s0 = smov %s554_s22 }
 0x25e   : > { %s632_s16 = smov %s543_s19  ;;  %20 = sbr.rel (!%p18_p7) target bundleno = 18 (0x12), region = 59 }
 0x263   :  { %296 = vsyncpa [#allocation6], 1 }
 0x264   :  { %298 = vsyncpa [#allocation6 + $0x1], 1 }

</bundles_post_ra>
